<compile_context>
chip_gen: v6e
topology: v6e:2x2x1
jax: 0.10.0
libtpu: 0.0.40
codegen_flags: <defaults>
</compile_context>

<pallas_src>
import functools

import jax
import jax.numpy as jnp
from jax.experimental import pallas as pl
from jax.experimental.pallas import tpu as pltpu


def _pixelnorm_kernel(x_ref, o_ref, *, epsilon, inv_c):
    # x_ref / o_ref: (C, HW_TILE) tile — one batch element, one spatial chunk.
    # f32 accumulation only inside the sum-of-squares; re-index x_ref for the
    # final multiply (plenty of vld slack in this HBM-bound kernel) to keep
    # vreg / VMEM pressure low for large tiles.
    xf = x_ref[...].astype(jnp.float32)
    sum_sq = jnp.sum(xf * xf, axis=0, keepdims=True)         # (1, HW_TILE) f32
    inv = jax.lax.rsqrt(sum_sq * inv_c + epsilon)             # (1, HW_TILE) f32
    o_ref[...] = (x_ref[...] * inv.astype(o_ref.dtype)).astype(o_ref.dtype)


def _round_up(v, m):
    return (v + m - 1) // m * m


def _round_down(v, m):
    return (v // m) * m


def _vmem_budget_bytes():
    # 4 resident tiles (in + out, double-buffered).  Stay under each
    # generation's default scoped-VMEM limit so vmem_limit_bytes is not needed:
    #   v5e: 16 MiB default scoped VMEM -> ~10 MiB budget
    #   v6e / v7x: 32 MiB default scoped VMEM -> ~20 MiB budget
    #   (also respects v7x's smaller 64 MiB physical VMEM per TensorCore)
    try:
        kind = jax.devices()[0].device_kind.lower()
    except Exception:
        kind = ""
    if "v5 lite" in kind or "v5lite" in kind or "v5e" in kind:
        return 10 * 1024 * 1024
    return 20 * 1024 * 1024


def pixel_norm(x, epsilon=1e-8):
    """PixelNormLayer forward. x: (N, C, H, W) -> (N, C, H, W)."""
    n, c, h, w = x.shape
    hw = h * w
    dsize = jnp.dtype(x.dtype).itemsize

    # Lane-tile for the HW axis, sized from the VMEM budget, 128-lane aligned.
    hw_ceil = _round_up(hw, 128)                    # minimal lane extent
    budget = _vmem_budget_bytes()
    hw_tile = max(128, _round_down(budget // (4 * c * dsize), 128))
    hw_tile = min(hw_tile, hw_ceil)

    # With a single batch element, keep >= 2 HW blocks (when there is anything
    # to split) so the v7x megacore can shard the "parallel" HW axis.
    if n == 1 and hw_tile >= hw_ceil and hw_ceil >= 256:
        hw_tile = max(128, _round_down(hw_ceil // 2, 128))

    num_hw_blocks = pl.cdiv(hw, hw_tile)

    # No HBM-side padding or post-call slicing: the last HW block is partial
    # (loads padded with garbage, stores masked).  Correct because each lane
    # (pixel) depends only on its own column.
    x_flat = x.reshape(n, c, hw)

    kernel = functools.partial(
        _pixelnorm_kernel, epsilon=float(epsilon), inv_c=1.0 / float(c))

    cost = pl.CostEstimate(
        flops=3 * n * c * hw,            # square + reduce-add + final multiply
        transcendentals=n * hw,          # one rsqrt per pixel
        bytes_accessed=2 * n * c * hw * dsize,
    )

    # TODO(synk): for tiny channel counts (C < 8 f32 / C < 16 bf16) the sublane
    # axis is padded; real PixelNorm uses C >= 128 so no sublane repacking here.
    out_flat = pl.pallas_call(
        kernel,
        out_shape=jax.ShapeDtypeStruct((n, c, hw), x.dtype),
        grid_spec=pltpu.PrefetchScalarGridSpec(
            num_scalar_prefetch=0,
            grid=(n, num_hw_blocks),
            in_specs=[
                # Squeeze the batch dim; kernel sees a (C, HW_TILE) tile.
                pl.BlockSpec((None, c, hw_tile), lambda i, j: (i, 0, j)),
            ],
            out_specs=pl.BlockSpec((None, c, hw_tile), lambda i, j: (i, 0, j)),
        ),
        compiler_params=pltpu.CompilerParams(
            # Per-pixel normalization: both grid axes are fully independent.
            dimension_semantics=("parallel", "parallel"),
        ),
        cost_estimate=cost,
    )(x_flat)

    return out_flat.reshape(n, c, h, w)


def _reference(x, epsilon=1e-8):
    ms = jnp.mean(x.astype(jnp.float32) ** 2, axis=1, keepdims=True)
    return (x * jax.lax.rsqrt(ms + epsilon).astype(x.dtype)).astype(x.dtype)


if __name__ == "__main__":
    key = jax.random.PRNGKey(0)

    # Primary test: module-consistent small shape, f32.
    x = jax.random.normal(key, (2, 4, 16, 16), dtype=jnp.float32)
    y = pixel_norm(x, epsilon=1e-8)
    jax.block_until_ready(y)
    y_ref = _reference(x, epsilon=1e-8)
    assert y.shape == x.shape and y.dtype == x.dtype
    assert jnp.allclose(y, y_ref, atol=1e-5, rtol=1e-5)

    # Secondary test: exercises the partial-last-block path (H*W not a multiple
    # of 128) and the bf16 low-precision multiply path.
    key2 = jax.random.PRNGKey(1)
    x2 = jax.random.normal(key2, (1, 8, 5, 7), dtype=jnp.bfloat16)
    y2 = pixel_norm(x2, epsilon=1e-8)
    jax.block_until_ready(y2)
    y2_ref = _reference(x2, epsilon=1e-8)
    assert y2.shape == x2.shape and y2.dtype == x2.dtype
    assert jnp.allclose(y2.astype(jnp.float32), y2_ref.astype(jnp.float32),
                        atol=2e-2, rtol=2e-2)

    print("KERNEL_OK")
</pallas_src>

<mosaic_0001>
module attributes {stable_mosaic.version = 11 : i64} {
  func.func @_pixelnorm_kernel(%arg0: i32, %arg1: i32, %arg2: memref<1x4x256xf32, #tpu.memory_space<vmem>>, %arg3: memref<1x4x256xf32, #tpu.memory_space<vmem>>) attributes {dimension_semantics = [#tpu.dimension_semantics<parallel>, #tpu.dimension_semantics<parallel>], iteration_bounds = array<i64: 2, 1>, scalar_prefetch = 0 : i64, scratch_operands = 0 : i64, tpu.core_type = #tpu.core_type<tc>, window_params = [{transform_indices = @transform_0, window_bounds = array<i64: 1, 4, 256>}, {transform_indices = @transform_1, window_bounds = array<i64: 1, 4, 256>}]} {
    %c0 = arith.constant 0 : index
    %c0_0 = arith.constant 0 : index
    %c0_1 = arith.constant 0 : index
    %0 = vector.load %arg2[%c0, %c0_0, %c0_1] : memref<1x4x256xf32, #tpu.memory_space<vmem>>, vector<1x4x256xf32>
    %1 = vector.shape_cast %0 : vector<1x4x256xf32> to vector<4x256xf32>
    %2 = arith.mulf %1, %1 : vector<4x256xf32>
    %cst = arith.constant dense<0.000000e+00> : vector<256xf32>
    %3 = vector.multi_reduction <add>, %2, %cst [0] : vector<4x256xf32> to vector<256xf32>
    %4 = vector.shape_cast %3 : vector<256xf32> to vector<1x256xf32>
    %cst_2 = arith.constant 2.500000e-01 : f32
    %5 = vector.broadcast %cst_2 : f32 to vector<1x256xf32>
    %6 = arith.mulf %4, %5 : vector<1x256xf32>
    %cst_3 = arith.constant 9.99999993E-9 : f32
    %7 = vector.broadcast %cst_3 : f32 to vector<1x256xf32>
    %8 = arith.addf %6, %7 : vector<1x256xf32>
    %9 = math.rsqrt %8 : vector<1x256xf32>
    %c0_4 = arith.constant 0 : index
    %c0_5 = arith.constant 0 : index
    %c0_6 = arith.constant 0 : index
    %10 = vector.load %arg2[%c0_4, %c0_5, %c0_6] : memref<1x4x256xf32, #tpu.memory_space<vmem>>, vector<1x4x256xf32>
    %11 = vector.shape_cast %10 : vector<1x4x256xf32> to vector<4x256xf32>
    %12 = vector.broadcast %9 : vector<1x256xf32> to vector<4x256xf32>
    %13 = arith.mulf %11, %12 : vector<4x256xf32>
    %c0_7 = arith.constant 0 : index
    %c0_8 = arith.constant 0 : index
    %c0_9 = arith.constant 0 : index
    %14 = vector.load %arg3[%c0_7, %c0_8, %c0_9] : memref<1x4x256xf32, #tpu.memory_space<vmem>>, vector<1x4x256xf32>
    %15 = vector.shape_cast %14 : vector<1x4x256xf32> to vector<4x256xf32>
    %16 = vector.shape_cast %13 : vector<4x256xf32> to vector<1x4x256xf32>
    tpu.vector_store %arg3[%c0_7, %c0_8, %c0_9], %16 {strides = array<i32>} : memref<1x4x256xf32, #tpu.memory_space<vmem>>, vector<1x4x256xf32>,
    return
  }
  func.func @transform_0(%arg0: i32, %arg1: i32) -> (i32, i32, i32) {
    %c0_i32 = arith.constant 0 : i32
    %c0_i32_0 = arith.constant 0 : i32
    return %arg0, %c0_i32, %arg1 : i32, i32, i32
  }
  func.func @transform_1(%arg0: i32, %arg1: i32) -> (i32, i32, i32) {
    %c0_i32 = arith.constant 0 : i32
    %c0_i32_0 = arith.constant 0 : i32
    return %arg0, %c0_i32, %arg1 : i32, i32, i32
  }
}

</mosaic_0001>

<bundles_post_ra>
// kernel: tpu_custom_call.1
= control target key start
LH: loop header
LB: loop body
LE: loop exit
PB: predicated region body
PF: predicated region fallthrough
CT: control target
= control target key end

     0   :  { %6 = vsyncpa [#allocation3], 0  ;;  %s629_s0 = inlined_call_operand.hbm [shape: f32[2,4,256], index: 0, kind: input, shape index: {}]   ;;  %s630_s1 = inlined_call_operand.hbm [shape: f32[2,4,256], index: 1, kind: output, shape index: {}]  }
   0x1   :  { %8 = vsyncpa [#allocation3 + $0x1], 0 }
   0x2   :  { %9 = vsyncpa [#allocation4], 0 }
   0x3   :  { %11 = vsyncpa [#allocation4 + $0x1], 0  ;;  %s491_s6 = smov 0   ;;  %s493_s7 = smov 0  }
   0x4   :  { %s495_s8 = smov 0   ;;  %s497_s9 = smov 0  }
   0x5   :  { %s499_s10 = smov 0   ;;  %s501_s11 = smov 0  }
   0x6 LB: > { %s286_s12 = sadd.s32 4294967295, %s477_s11   ;;  %s287_s13 = sadd.s32 4294967294, %s477_s11   ;;  %s477_s11 = sphi %s501_s11, %s17_s11   ;;  %s473_s10 = sphi %s499_s10, %s642_s10   ;;  %s469_s9 = sphi %s497_s9, %s641_s9   ;;  %s465_s8 = sphi %s495_s8, %s640_s8   ;;  %s461_s7 = sphi %s493_s7, %s639_s7   ;;  %s457_s6 = sphi %s491_s6, %s638_s6  }
   0x7   : > { %s29_s14 = sadd.s32 1, %s473_s10  ;;  %s38_s15 = sadd.s32 1, %s465_s8 }
   0x8   : > { %p31_p0 = scmp.ge.s32.totalorder %s29_s14, 2  ;;  %p45_p1 = scmp.ne.s32.totalorder %s465_s8, %s461_s7 }
   0x9   : > { %p46_p2 = scmp.eq.s32.totalorder %s477_s11, 0  ;;  %p51_p3 = scmp.ne.s32.totalorder %s461_s7, %s457_s6 }
   0xa   : > { %s644_s14 = smov (%p31_p0, %s29_s14), 0  ;;  %p52_p5 = scmp.eq.s32.totalorder %s286_s12, 0 }
   0xb   : > { %p532_p4 = por %p46_p2, %p45_p1  ;;  %s33_s17 = ssub.s32 %s473_s10, %s644_s14 }
   0xc   : > { %p77_p6 = scmp.eq.s32.totalorder %s286_s12, 1  ;;  %p36_p7 = scmp.eq.s32.totalorder %s33_s17, 0 }
   0xd   : > { %p538_p8 = por %p52_p5, %p51_p3  ;;  %p83_p10 = scmp.eq.s32.totalorder %s287_s13, 1 }
   0xe   : > { %p542_p9 = por %p77_p6, %p45_p1  ;;  %p315_p13 = scmp.lt.s32.totalorder %s477_s11, 2 }
   0xf   : > { %s547_s20 = scalar_select %p36_p7, %s465_s8, %s38_s15  }
  0x10   : > { %p549_p11 = por %p83_p10, %p51_p3  ;;  %s103_s22 = sand.u32 1, %s465_s8  }
  0x11   : > { %s290_s23 = sshll.u32 %s103_s22, 3  ;;  %s301_s24 = sshll.u32 %s473_s10, 7 }
  0x12   : > { %s634_s21 = scalar_select %p549_p11, 1, 0 }
  0x13   : > { %s115_s27 = scalar_lea.hbm %s629_s0, %s301_s24  ;;  %s107_s28 = scalar_lea.vmem [#allocation2], %s290_s23 }
  0x14   : > { %s117_s29 = sshll.u32 %s107_s28, 4  ;;  %p562_p0 = pnand %p315_p13, %p532_p4  ;;  %s118_s29 = int_to_ptr.vmem [resolvable:$true] %s117_s29 }
  0x15   : > { %p293_p1 = scmp.ge.s32.totalorder %s477_s11, 1  ;;  %p122_p2 = scmp.lt.s32.totalorder %s477_s11, 3 }
  0x16   : > { %s104_s2 = scalar_lea.sflag [#allocation3], %s103_s22  ;;  %p371_p3 = pneg %p562_p0 }
  0x17   : > { %s382_s3 = scalar_lea.vmem %s118_s29, 128  ;;  %s479_s4 = smov [#allocation2]  }
  0x18   : > { %p383_p5 = scmp.ne.s32.totalorder %s118_s29, %s382_s3  ;;  %s387_s5 = sshll.u32 %s479_s4, 4  ;;  %s388_s5 = int_to_ptr.vmem [resolvable:$false] %s387_s5 }
  0x19   : > { %s389_s12 = scalar_lea.vmem %s388_s5, 256  ;;  %p390_p10 = scmp.lt.s32.totalorder %s118_s29, %s388_s5 }
  0x1a   : > { %p385_p6 = pnand %p383_p5, %p371_p3  ;;  %p391_p12 = scmp.lt.s32.totalorder %s389_s12, %s382_s3 }
  0x1c   : > { %p386_p7 = pneg %p385_p6  ;;  %p392_p4 = por %p391_p12, %p390_p10 }
  0x1e   : > { %p393_p13 = pnand %p392_p4, %p386_p7 }
  0x20   : > { %396 = shalt.err (!%p393_p13)
}
  0x21   : > { %310 = dma.hbm_to_vmem [thread:$0]  (!%p562_p0), %s115_s27, 128, %s118_s29, %s104_s2  }
  0x22   : > { %p123_p11 = pnand %p293_p1, %p122_p2 }
  0x23   : > { %s577_s13 = sand.u32 (!%p123_p11), 1, %s461_s7  }
  0x24   : > { %126 = sbr.rel (%p123_p11) target bundleno = 95 (0x5f), region = 24  ;;  %s294_s15 = sshll.u32 (!%p123_p11), %s577_s13, 3 }
  0x25   : > { %s129_s16 = scalar_lea.sflag (!%p123_p11), [#allocation3], %s577_s13  ;;  %s132_s17 = scalar_lea.vmem (!%p123_p11), [#allocation2], %s294_s15 }
  0x29   : > { %448 = dma.done.wait (%p538_p8), %s129_s16, 128  }
  0x2a   : > { %450 = vsyncadd (%p538_p8), %s129_s16, 4294967168  ;;  %v153_v0 = vld [vmem:[%s132_s17] sm:$0xff]  ;;  %vm158_vm0 = vcmask 1043456   ;;  %s150_s18 = scalar_lea.vmem [#allocation5], %s294_s15  ;;  %s302_s23 = sshll.u32 %s469_s9, 7 }
  0x2b   : > { %v154_v1 = vmul.f32 %v153_v0, %v153_v0  ;;  %s202_s22 = sshll.u32 %s150_s18, 4  ;;  %s200_s26 = scalar_lea.hbm %s630_s1, %s302_s23  ;;  %s203_s22 = int_to_ptr.vmem [resolvable:$true] %s202_s22 }
  0x2c   : > { %s186_s27 = scalar_lea.sflag [#allocation4], %s577_s13  ;;  %s397_s28 = scalar_lea.vmem %s203_s22, 128 }
  0x2d   : > { %v156_v2 = vcombine.high %v154_v1, %v154_v1  ;;  %v159_v3 = vsel %vm158_vm0, %v154_v1, 0.0  ;;  %p398_p8 = scmp.ne.s32.totalorder %s203_s22, %s397_s28  ;;  %s480_s29 = smov [#allocation5]  }
  0x2e   : > { %v160_v4 = vrot.slane %v159_v3, 4  ;;  %s401_s30 = sshll.u32 %s480_s29, 4  ;;  %s402_s30 = int_to_ptr.vmem [resolvable:$false] %s401_s30 }
  0x2f   : > { %v166_v5 = vsel %vm158_vm0, %v156_v2, 0.0  ;;  %p399_p11 = pnand %p398_p8, %p542_p9  ;;  %s403_s2 = scalar_lea.vmem %s402_s30, 256 }
  0x30   : > { %v161_v6 = vadd.f32 %v160_v4, %v159_v3  ;;  %v167_v7 = vrot.slane %v166_v5, 4  ;;  %p404_p0 = scmp.lt.s32.totalorder %s203_s22, %s402_s30  ;;  %p405_p1 = scmp.lt.s32.totalorder %s403_s2, %s397_s28 }
  0x31   : > { %p400_p12 = pneg %p399_p11 }
  0x32   : > { %v162_v8 = vrot.slane %v161_v6, 2  ;;  %v168_v9 = vadd.f32 %v167_v7, %v166_v5  ;;  %p406_p2 = por %p405_p1, %p404_p0 }
  0x34   : > { %v163_v10 = vadd.f32 %v162_v8, %v161_v6  ;;  %v169_v11 = vrot.slane %v168_v9, 2  ;;  %p407_p3 = pnand %p406_p2, %p400_p12 }
  0x36   : > { %v164_v12 = vrot.slane %v163_v10, 1  ;;  %v170_v13 = vadd.f32 %v169_v11, %v168_v9 }
  0x38   : > { %v165_v14 = vadd.f32 %v164_v12, %v163_v10  ;;  %v171_v15 = vrot.slane %v170_v13, 1 }
  0x3a   : > { %v172_v16 = vadd.f32 %v171_v15, %v170_v13  ;;  %v173_v17 = vmul.f32 0.25, %v165_v14 }
  0x3c   : > { %v174_v18 = vmul.f32 0.25, %v172_v16  ;;  %v175_v19 = vadd.f32 1e-08, %v173_v17 }
  0x3e   : > { %v176_v20 = vadd.f32 1e-08, %v174_v18  ;;  %365 = vrsqrt.f32 %v175_v19 }
  0x40   : > { %367 = vrsqrt.f32 %v176_v20 }
  0x4b   : > { %v366_v21 = vpop.eup %365 }
  0x4d   : > { %v368_v22 = vpop.eup %367 }
  0x4e   : > { %v181_v23 = vcombine.low %v366_v21, %v368_v22 }
  0x50   : > { %v183_v24 = vmul.f32 %v181_v23, %v153_v0 }
  0x52   : > { %184 = vst [vmem:[%s150_s18] sm:$0xff] %v183_v24 }
  0x53   : > { %410 = shalt.err (!%p407_p3)
}
  0x54   : > { %s411_s9 = scalar_lea.hbm %s200_s26, 128  ;;  %s415_s5 = scalar_lea.hbm %s630_s1, 256 }
  0x55   : > { %p412_p5 = scmp.ne.s32.totalorder %s200_s26, %s411_s9  ;;  %p416_p10 = scmp.lt.s32.totalorder %s200_s26, %s630_s1 }
  0x56   : > { %p417_p4 = scmp.lt.s32.totalorder %s415_s5, %s411_s9 }
  0x57   : > { %p413_p6 = pnand %p412_p5, %p542_p9 }
  0x58   : > { %p418_p13 = por %p417_p4, %p416_p10 }
  0x59   : > { %p414_p7 = pneg %p413_p6 }
  0x5b   : > { %p419_p8 = pnand %p418_p13, %p414_p7 }
  0x5d   : > { %422 = shalt.err (!%p419_p8)
}
  0x5e   : > { %305 = dma.vmem_to_hbm [thread:$0]  (%p542_p9), %s203_s22, 128, %s200_s26, %s186_s27  }
  0x5f PF: > { %s214_s15 = sand.u32 1, %s457_s6   ;;  %p636_p11 = scmp.ne.s32.totalorder %s634_s21, 0 }
  0x60   : > { %p637_p12 = scmp.ge.s32.totalorder %s477_s11, 2  ;;  %s215_s16 = scalar_lea.sflag [#allocation4], %s214_s15 }
  0x62   : > { %p312_p0 = pnand %p637_p12, %p636_p11 }
  0x64   : > { %p313_p1 = pneg %p312_p0 }
  0x66   : > { %452 = dma.done.wait (%p313_p1), %s215_s16, 128  }
  0x67   : > { %454 = vsyncadd (%p313_p1), %s215_s16, 4294967168  ;;  %s17_s11 = sadd.s32 1, %s477_s11   ;;  %s638_s6 = smov %s461_s7 }
  0x68   : > { %p14_p2 = scmp.ge.s32.totalorder %s17_s11, 4   ;;  %s639_s7 = smov %s465_s8 }
  0x69   : > { %s640_s8 = smov %s547_s20  ;;  %s641_s9 = smov %s473_s10 }
  0x6a   : > { %s642_s10 = smov %s644_s14  ;;  %16 = sbr.rel (!%p14_p2) target bundleno = 6 (0x6), region = 69 }
  0x6f   :  { %220 = vsyncpa [#allocation3], 1 }
  0x70   :  { %222 = vsyncpa [#allocation3 + $0x1], 1 }
  0x71   :  { %223 = vsyncpa [#allocation4], 1 }
  0x72   :  { %225 = vsyncpa [#allocation4 + $0x1], 1 }

</bundles_post_ra>
